<compile_context>
chip_gen: v5e
topology: v5e:2x2
jax: 0.10.0
libtpu: 0.0.40
codegen_flags: <defaults>
</compile_context>

<pallas_src>
import jax
import jax.numpy as jnp
from jax.experimental import pallas as pl
from jax.experimental.pallas import tpu as pltpu

_LANE = 128
_MAX_C = 8192                 # max lane-dense slab width (multiple of 128)
_ROW_ALIGN = 32               # sublane alignment good for f32/bf16/int8/fp8
_MIN_BLOCK_BYTES = 4 * 1024 * 1024
_MAX_BLOCK_BYTES = 16 * 1024 * 1024
_FALLBACK_VMEM_CAPACITY = 64 * 1024 * 1024   # conservative (v7x per-TC)


def _gelu2_kernel(x_ref, o_ref):
    x = x_ref[...]
    xf = x.astype(jnp.float32)
    # x * sigmoid(1.702*x): EUP handles the transcendental, VPU the muls —
    # both have huge slack under the DMA for this memory-bound op.
    o_ref[...] = (xf * jax.nn.sigmoid(1.702 * xf)).astype(o_ref.dtype)


def _vmem_capacity_bytes() -> int:
    try:
        return int(pltpu.get_tpu_info().vmem_capacity_bytes)
    except Exception:
        return _FALLBACK_VMEM_CAPACITY


def _round_up(x: int, m: int) -> int:
    return ((x + m - 1) // m) * m


def _choose_layout(n_elems: int, itemsize: int, target_block_bytes: int):
    """Pick (C, rows, block_rows) for a lane-dense (rows, C) slab of n_elems.

    Requires n_elems % 128 == 0.
    """
    # Widest multiple of 128 that divides n_elems, capped at _MAX_C.
    c = min(_MAX_C, (n_elems // _LANE) * _LANE)
    c = max(c, _LANE)
    while c > _LANE and n_elems % c != 0:
        c -= _LANE
    rows = n_elems // c

    target_rows = max(1, target_block_bytes // (c * itemsize))
    if target_rows >= rows:
        # Whole array fits in one block. Still split into >= 2 grid steps when
        # the row count allows: overlaps writeback with the next fetch and
        # engages both TensorCores on v7x. Costs only ~0.35 us of extra
        # per-step overhead elsewhere.
        if rows >= 2 * _ROW_ALIGN:
            block_rows = _round_up(-(-rows // 2), _ROW_ALIGN)   # ~half, 32-aligned
        else:
            block_rows = rows
    else:
        block_rows = max(_ROW_ALIGN, (target_rows // _ROW_ALIGN) * _ROW_ALIGN)
        block_rows = min(block_rows, rows)
    return c, rows, block_rows


def _gelu2_jnp(x: jax.Array) -> jax.Array:
    # Plain fused-elementwise path; already HBM-roofline for odd sizes.
    return x * jax.nn.sigmoid(1.702 * x)


def gelu2(x: jax.Array) -> jax.Array:
    """Elementwise GELU2 on an arbitrary-shaped array (e.g. NCHW)."""
    orig_shape = x.shape
    dtype = x.dtype
    n = x.size
    if n == 0:
        return x
    itemsize = jnp.dtype(dtype).itemsize

    # Pallas path only for lane-friendly element counts (typical NCHW
    # activations); anything else goes to the fused-jnp fallback — no
    # pad/concat or output-slice copies.
    if n % _LANE != 0:
        return _gelu2_jnp(x)

    # Generation-aware block size: ~capacity/8, clamped to [4, 16] MiB.
    # v7x (64 MiB VMEM/TC) -> 8 MiB blocks; v5e/v6e (128 MiB) -> 16 MiB blocks.
    capacity = _vmem_capacity_bytes()
    target_block_bytes = min(_MAX_BLOCK_BYTES, max(_MIN_BLOCK_BYTES, capacity // 8))

    c, rows, block_rows = _choose_layout(n, itemsize, target_block_bytes)
    x2d = jnp.ravel(x).reshape(rows, c)

    grid = (pl.cdiv(rows, block_rows),)
    block_bytes = block_rows * c * itemsize
    # 2 double-buffered input tiles + 2 output tiles, plus headroom; keep the
    # limit comfortably under physical VMEM (64 MiB on v7x, 128 MiB v5e/v6e).
    vmem_limit = min(4 * block_bytes + (4 << 20), (capacity * 3) // 4)
    vmem_limit = max(vmem_limit, 32 * 1024 * 1024)

    out2d = pl.pallas_call(
        _gelu2_kernel,
        out_shape=jax.ShapeDtypeStruct((rows, c), dtype),
        grid=grid,
        in_specs=[pl.BlockSpec((block_rows, c), lambda i: (i, 0))],
        out_specs=pl.BlockSpec((block_rows, c), lambda i: (i, 0)),
        compiler_params=pltpu.CompilerParams(
            dimension_semantics=("parallel",),
            vmem_limit_bytes=int(vmem_limit),
        ),
    )(x2d)

    return out2d.reshape(orig_shape)


def gelu2_ref(x):
    return x * jax.nn.sigmoid(1.702 * x)


if __name__ == "__main__":
    key = jax.random.PRNGKey(0)

    # NCHW input, as the PyTorch module would typically see.
    x = jax.random.normal(key, (2, 4, 16, 16), dtype=jnp.float32)
    out = jax.block_until_ready(gelu2(x))
    ref = gelu2_ref(x)
    assert out.shape == x.shape and out.dtype == x.dtype
    assert jnp.allclose(out, ref, atol=1e-6, rtol=1e-6), "mismatch vs reference"

    # Odd-sized input exercises the fused-jnp fallback (no Pallas, no copies).
    x2 = jax.random.normal(jax.random.PRNGKey(1), (3, 5, 7, 11), dtype=jnp.float32)
    out2 = jax.block_until_ready(gelu2(x2))
    ref2 = gelu2_ref(x2)
    assert out2.shape == x2.shape and out2.dtype == x2.dtype
    assert jnp.allclose(out2, ref2, atol=1e-6, rtol=1e-6), "mismatch (fallback)"

    # bf16 input exercises the narrow-dtype path (storage stays bf16 in HBM).
    x3 = jax.random.normal(jax.random.PRNGKey(2), (2, 8, 32, 128), dtype=jnp.bfloat16)
    out3 = jax.block_until_ready(gelu2(x3))
    ref3 = gelu2_ref(x3.astype(jnp.float32)).astype(jnp.bfloat16)
    assert out3.shape == x3.shape and out3.dtype == x3.dtype
    assert jnp.allclose(out3.astype(jnp.float32), ref3.astype(jnp.float32),
                        atol=2e-2, rtol=2e-2), "mismatch vs reference (bf16)"

    # TODO(synk): if GELU2 follows a matmul/conv, fuse it into that producer's
    # epilogue instead of running it as a standalone 2N-byte elementwise kernel.
    print("KERNEL_OK")
</pallas_src>

<mosaic_0001>
module attributes {stable_mosaic.version = 11 : i64} {
  func.func @_gelu2_kernel(%arg0: i32, %arg1: memref<1x2048xf32, #tpu.memory_space<vmem>>, %arg2: memref<1x2048xf32, #tpu.memory_space<vmem>>) attributes {dimension_semantics = [#tpu.dimension_semantics<parallel>], iteration_bounds = array<i64: 1>, scalar_prefetch = 0 : i64, scratch_operands = 0 : i64, tpu.core_type = #tpu.core_type<tc>, window_params = [{transform_indices = @transform_0, window_bounds = array<i64: 1, 2048>}, {transform_indices = @transform_1, window_bounds = array<i64: 1, 2048>}]} {
    %c0 = arith.constant 0 : index
    %c0_0 = arith.constant 0 : index
    %0 = vector.load %arg1[%c0, %c0_0] : memref<1x2048xf32, #tpu.memory_space<vmem>>, vector<1x2048xf32>
    %cst = arith.constant 1.702000e+00 : f32
    %1 = vector.broadcast %cst : f32 to vector<1x2048xf32>
    %2 = arith.mulf %1, %0 : vector<1x2048xf32>
    %3 = arith.negf %2 : vector<1x2048xf32>
    %4 = math.exp %3 : vector<1x2048xf32>
    %cst_1 = arith.constant 1.000000e+00 : f32
    %5 = vector.broadcast %cst_1 : f32 to vector<1x2048xf32>
    %6 = arith.addf %5, %4 : vector<1x2048xf32>
    %7 = arith.divf %5, %6 : vector<1x2048xf32>
    %8 = arith.mulf %0, %7 : vector<1x2048xf32>
    %c0_2 = arith.constant 0 : index
    %c0_3 = arith.constant 0 : index
    %9 = vector.load %arg2[%c0_2, %c0_3] : memref<1x2048xf32, #tpu.memory_space<vmem>>, vector<1x2048xf32>
    tpu.vector_store %arg2[%c0_2, %c0_3], %8 {strides = array<i32>} : memref<1x2048xf32, #tpu.memory_space<vmem>>, vector<1x2048xf32>,
    return
  }
  func.func @transform_0(%arg0: i32) -> (i32, i32) {
    %c0_i32 = arith.constant 0 : i32
    %c0_i32_0 = arith.constant 0 : i32
    return %arg0, %c0_i32 : i32, i32
  }
  func.func @transform_1(%arg0: i32) -> (i32, i32) {
    %c0_i32 = arith.constant 0 : i32
    %c0_i32_0 = arith.constant 0 : i32
    return %arg0, %c0_i32 : i32, i32
  }
}

</mosaic_0001>

<bundles_post_ra>
// kernel: tpu_custom_call.1
= control target key start
LH: loop header
LB: loop body
LE: loop exit
PB: predicated region body
PF: predicated region fallthrough
CT: control target
= control target key end

     0   :  { %6 = vsyncpa [#allocation3], 0  ;;  %s168_s0 = inlined_call_operand.hbm [shape: f32[1,2048], index: 0, kind: input, shape index: {}]   ;;  %s169_s1 = inlined_call_operand.hbm [shape: f32[1,2048], index: 1, kind: output, shape index: {}]  }
   0x1   :  { %7 = vsyncpa [#allocation4], 0  ;;  %s13_s8 = sshll.u32 %s168_s0, 4  ;;  %s150_s9 = smov [#allocation2]   ;;  %s14_s8 = int_to_ptr.hbm [resolvable:$true] %s13_s8 }
   0x2   :  { %s15_s10 = sshll.u32 %s150_s9, 4  ;;  %s16_s10 = int_to_ptr.vmem [resolvable:$true] %s15_s10 }
   0x3   :  { %18 = dma.hbm_to_vmem [thread:$0]  %s14_s8, 256, %s16_s10, [#allocation3]  }
   0x4   :  { %146 = dma.done.wait [#allocation3], 256  }
   0x5   :  { %147 = vsyncadd [#allocation3], 4294967040  ;;  %v23_v0 = vld [vmem:[#allocation2] sm:$0xff]  ;;  %v24_v1 = vld [vmem:[#allocation2 + $0x8] sm:$0xff]  ;;  %s151_s0 = smov [#allocation5]   ;;  %s76_s14 = sshll.u32 %s169_s1, 4  ;;  %s77_s14 = int_to_ptr.hbm [resolvable:$true] %s76_s14 }
   0x6   :  { %v86_v2 = vmul.f32 -1.702, %v23_v0  ;;  %v87_v3 = vmul.f32 -1.702, %v24_v1  ;;  %s74_s11 = sshll.u32 %s151_s0, 4  ;;  %s75_s11 = int_to_ptr.vmem [resolvable:$true] %s74_s11 }
   0x8   :  { %v29_v4 = vmul.f32 1.442695, %v86_v2  ;;  %v31_v5 = vmul.f32 1.442695, %v87_v3 }
   0xa   :  { %90 = vpow2.f32 %v29_v4 }
   0xb   :  { %92 = vpow2.f32 %v31_v5 }
  0x10   :  { %v91_v6 = vpop.eup %90 }
  0x11   :  { %v93_v7 = vpop.eup %92  ;;  %v33_v8 = vadd.f32 1.0, %v91_v6 }
  0x12   :  { %v34_v9 = vadd.f32 1.0, %v93_v7 }
  0x13   :  { %94 = vrcp.f32 %v33_v8  ;;  %vm40_vm0 = vweird.f32 %v33_v8  ;;  %v46_v13 = vand.u32 2147483648, %v33_v8  ;;  %v44_v16 = vand.u32 2147483647, %v33_v8 }
  0x14   :  { %96 = vrcp.f32 %v34_v9  ;;  %v61_v17 = vand.u32 2147483648, %v34_v9  ;;  %vm55_vm2 = vweird.f32 %v34_v9  ;;  %v59_v19 = vand.u32 2147483647, %v34_v9 }
  0x15   :  { %v47_v21 = vor.u32 1.1754944e-38, %v46_v13  ;;  %vm45_vm5 = vcmp.eq.f32.partialorder %v44_v16, 8.507059e+37 }
  0x16   :  { %v62_v24 = vor.u32 1.1754944e-38, %v61_v17  ;;  %vm60_vm7 = vcmp.eq.f32.partialorder %v59_v19, 8.507059e+37 }
  0x19   :  { %v95_v10 = vpop.eup %94 }
  0x1a   :  { %v97_v11 = vpop.eup %96  ;;  %v36_v12 = vmul.f32 %v95_v10, %v33_v8  ;;  %vm41_vm1 = vweird.f32 %v95_v10 }
  0x1b   :  { %v51_v14 = vmul.f32 %v97_v11, %v34_v9  ;;  %vm56_vm3 = vweird.f32 %v97_v11  ;;  %vm42_vm4 = vmor %vm40_vm0, %vm41_vm1 }
  0x1c   :  { %v37_v15 = vsub.f32 1.0, %v36_v12  ;;  %vm57_vm6 = vmor %vm55_vm2, %vm56_vm3 }
  0x1d   :  { %v52_v18 = vsub.f32 1.0, %v51_v14 }
  0x1e   :  { %v38_v20 = vmul.f32 %v95_v10, %v37_v15 }
  0x1f   :  { %v53_v22 = vmul.f32 %v97_v11, %v52_v18 }
  0x20   :  { %v39_v23 = vadd.f32 %v95_v10, %v38_v20 }
  0x21   :  { %v54_v25 = vadd.f32 %v97_v11, %v53_v22 }
  0x22   :  { %v43_v26 = vsel %vm42_vm4, %v95_v10, %v39_v23 }
  0x23   :  { %v48_v27 = vsel %vm45_vm5, %v47_v21, %v43_v26  ;;  %v58_v28 = vsel %vm57_vm6, %v97_v11, %v54_v25 }
  0x24   :  { %v65_v29 = vmul.f32 %v48_v27, %v23_v0  ;;  %v63_v30 = vsel %vm60_vm7, %v62_v24, %v58_v28 }
  0x25   :  { %v66_v31 = vmul.f32 %v63_v30, %v24_v1 }
  0x26   :  { %67 = vst [vmem:[#allocation5] sm:$0xff] %v65_v29 }
  0x27   :  { %68 = vst [vmem:[#allocation5 + $0x8] sm:$0xff] %v66_v31 }
  0x28   :  { %79 = dma.vmem_to_hbm [thread:$0]  %s75_s11, 256, %s77_s14, [#allocation4]  }
  0x29   :  { %148 = dma.done.wait [#allocation4], 256  }
  0x2a   :  { %149 = vsyncadd [#allocation4], 4294967040 }
  0x2b   :  { %84 = vsyncpa [#allocation3], 1 }
  0x2c   :  { %85 = vsyncpa [#allocation4], 1 }

</bundles_post_ra>
